<compile_context>
chip_gen: v5e
topology: v5e:2x2
jax: 0.10.0
libtpu: 0.0.40
codegen_flags: <defaults>
</compile_context>

<pallas_src>
import functools

import jax
import jax.numpy as jnp
from jax import lax
from jax.experimental import pallas as pl
from jax.experimental.pallas import tpu as pltpu

_LANES = 128


def _gce_kernel(pred_ref, lab_ref, out_ref, acc_ref, *, q, n_valid, inv_n, tm):
    """One row-tile of the generalized binary cross entropy reduction.

    pred_ref : (tm, 128) f32 VMEM  — logits tile
    lab_ref  : (tm, 128) i32 VMEM  — labels tile (0 / 1)
    out_ref  : (1, 1)    f32 VMEM  — final mean loss (written at last step)
    acc_ref  : (1, 128)  f32 VMEM  — per-lane partial-sum accumulator
    """
    i = pl.program_id(0)

    @pl.when(i == 0)
    def _init():
        acc_ref[...] = jnp.zeros_like(acc_ref)

    x = pred_ref[...]
    lab = lab_ref[...]

    # sigmoid (exp on EUP, elementwise on VPU)
    p = 1.0 / (1.0 + jnp.exp(-x))
    # probability assigned to the true class: p if label==1 else 1-p
    sel = jnp.where(lab == 1, p, 1.0 - p)
    sel = jnp.clip(sel, 1e-7, 1.0)
    # (1 - sel**q) / q  with  sel**q = exp(q * log(sel))   (sel >= 1e-7 > 0)
    gce = (1.0 - jnp.exp(q * jnp.log(sel))) * (1.0 / q)

    # mask out padding elements (flat index >= N contributes 0 to the sum)
    row = lax.broadcasted_iota(jnp.int32, (tm, _LANES), 0)
    lane = lax.broadcasted_iota(jnp.int32, (tm, _LANES), 1)
    flat = (i * tm + row) * _LANES + lane
    gce = jnp.where(flat < n_valid, gce, 0.0)

    # sublane reduce per tile; keep per-lane partials resident
    acc_ref[...] += jnp.sum(gce, axis=0, keepdims=True)

    @pl.when(i == pl.num_programs(0) - 1)
    def _finalize():
        # single cross-lane reduce + mean
        out_ref[...] = jnp.sum(acc_ref[...], axis=1, keepdims=True) * inv_n


def binary_gce_loss(pred, labels, *, q=0.7, block_rows=256):
    """Pallas implementation of BinaryGeneralizedCrossEntropy.forward.

    Args:
      pred:   (N, 1) float logits.
      labels: (N, 1) labels in {0, 1} (float or int).
      q:      GCE exponent (default 0.7).
      block_rows: rows of 128 lanes processed per grid step (multiple of 8).

    Returns:
      Scalar float32 loss.
    """
    assert pred.ndim == 2 and pred.shape[-1] == 1, "expects (N, 1) predictions"
    assert labels.shape[0] == pred.shape[0] and labels.shape[-1] == 1
    assert block_rows % 8 == 0
    n = pred.shape[0]

    x = pred[:, 0].astype(jnp.float32)
    lab = labels[:, 0].astype(jnp.int32)  # matches PyTorch .long() truncation

    # lane-dense layout: pad to a whole number of (tm, 128) tiles
    rows = pl.cdiv(n, _LANES)
    rows = ((rows + 7) // 8) * 8                    # sublane multiple
    tm = min(block_rows, rows)
    rows_pad = ((rows + tm - 1) // tm) * tm
    pad = rows_pad * _LANES - n

    x = jnp.pad(x, (0, pad)).reshape(rows_pad, _LANES)
    lab = jnp.pad(lab, (0, pad)).reshape(rows_pad, _LANES)

    kernel = functools.partial(
        _gce_kernel, q=float(q), n_valid=n, inv_n=1.0 / float(n), tm=tm)

    out = pl.pallas_call(
        kernel,
        grid_spec=pltpu.PrefetchScalarGridSpec(
            num_scalar_prefetch=0,
            grid=(rows_pad // tm,),
            in_specs=[
                pl.BlockSpec((tm, _LANES), lambda i: (i, 0)),
                pl.BlockSpec((tm, _LANES), lambda i: (i, 0)),
            ],
            out_specs=pl.BlockSpec((1, 1), lambda i: (0, 0)),
            scratch_shapes=[pltpu.VMEM((1, _LANES), jnp.float32)],
        ),
        out_shape=jax.ShapeDtypeStruct((1, 1), jnp.float32),
        compiler_params=pltpu.CompilerParams(
            dimension_semantics=("arbitrary",),      # reduction axis
            vmem_limit_bytes=32 * 1024 * 1024),
    )(x, lab)

    return out[0, 0]


if __name__ == "__main__":
    import numpy as np

    # small shapes consistent with the module: N = 2 * 16 * 16 per-pixel logits
    N = 512
    q = 0.7
    key = jax.random.PRNGKey(0)
    k1, k2 = jax.random.split(key)
    pred = jax.random.normal(k1, (N, 1), dtype=jnp.float32)
    labels = jax.random.bernoulli(k2, p=0.5, shape=(N, 1)).astype(jnp.float32)

    loss = binary_gce_loss(pred, labels, q=q)
    jax.block_until_ready(loss)

    # pure-JAX reference of the PyTorch module
    p = jax.nn.sigmoid(pred[:, 0])
    stacked = jnp.stack([1.0 - p, p], axis=-1)
    stacked = jnp.clip(stacked, 1e-7, 1.0)
    one_hot = jax.nn.one_hot(labels[:, 0].astype(jnp.int32), 2, dtype=jnp.float32)
    gce_ref = (1.0 - jnp.power(jnp.sum(one_hot * stacked, axis=1), q)) / q
    ref = jnp.mean(gce_ref)

    np.testing.assert_allclose(np.asarray(loss), np.asarray(ref),
                               rtol=1e-5, atol=1e-5)
    print("KERNEL_OK")
</pallas_src>

<mosaic_0001>
module attributes {stable_mosaic.version = 11 : i64} {
  func.func @_gce_kernel(%arg0: i32, %arg1: memref<8x128xf32, #tpu.memory_space<vmem>>, %arg2: memref<8x128xi32, #tpu.memory_space<vmem>>, %arg3: memref<1x1xf32, #tpu.memory_space<vmem>>, %arg4: memref<1x128xf32, #tpu.memory_space<vmem>>) attributes {dimension_semantics = [#tpu.dimension_semantics<arbitrary>], iteration_bounds = array<i64: 1>, scalar_prefetch = 0 : i64, scratch_operands = 1 : i64, tpu.core_type = #tpu.core_type<tc>, window_params = [{transform_indices = @transform_0, window_bounds = array<i64: 8, 128>}, {transform_indices = @transform_1, window_bounds = array<i64: 8, 128>}, {pipeline_mode = #tpu.pipeline_mode<synchronous>, transform_indices = @transform_2, window_bounds = array<i64: 1, 1>}]} {
    %c0_i32 = arith.constant 0 : i32
    %0 = arith.cmpi eq, %arg0, %c0_i32 : i32
    %1 = arith.extui %0 : i1 to i32
    %c0_i32_0 = arith.constant 0 : i32
    %2 = arith.cmpi ne, %1, %c0_i32_0 : i32
    scf.if %2 {
      %cst_20 = arith.constant 0.000000e+00 : f32
      %49 = vector.broadcast %cst_20 : f32 to vector<1x128xf32>
      %c0_21 = arith.constant 0 : index
      %c0_22 = arith.constant 0 : index
      %50 = vector.load %arg4[%c0_21, %c0_22] : memref<1x128xf32, #tpu.memory_space<vmem>>, vector<1x128xf32>
      tpu.vector_store %arg4[%c0_21, %c0_22], %49 {strides = array<i32>} : memref<1x128xf32, #tpu.memory_space<vmem>>, vector<1x128xf32>,
    } else {
    }
    %c0 = arith.constant 0 : index
    %c0_1 = arith.constant 0 : index
    %3 = vector.load %arg1[%c0, %c0_1] : memref<8x128xf32, #tpu.memory_space<vmem>>, vector<8x128xf32>
    %c0_2 = arith.constant 0 : index
    %c0_3 = arith.constant 0 : index
    %4 = vector.load %arg2[%c0_2, %c0_3] : memref<8x128xi32, #tpu.memory_space<vmem>>, vector<8x128xi32>
    %cst = arith.constant 0.000000e+00 : f32
    %5 = vector.broadcast %cst : f32 to vector<8x128xf32>
    %6 = arith.subf %5, %3 : vector<8x128xf32>
    %7 = math.exp %6 : vector<8x128xf32>
    %cst_4 = arith.constant 1.000000e+00 : f32
    %8 = vector.broadcast %cst_4 : f32 to vector<8x128xf32>
    %9 = arith.addf %8, %7 : vector<8x128xf32>
    %cst_5 = arith.constant 1.000000e+00 : f32
    %10 = vector.broadcast %cst_5 : f32 to vector<8x128xf32>
    %11 = arith.divf %10, %9 : vector<8x128xf32>
    %c1_i32 = arith.constant 1 : i32
    %12 = vector.broadcast %c1_i32 : i32 to vector<8x128xi32>
    %13 = arith.cmpi eq, %4, %12 : vector<8x128xi32>
    %cst_6 = arith.constant 1.000000e+00 : f32
    %14 = vector.broadcast %cst_6 : f32 to vector<8x128xf32>
    %15 = arith.subf %14, %11 : vector<8x128xf32>
    %16 = arith.select %13, %11, %15 : vector<8x128xi1>, vector<8x128xf32>
    %cst_7 = arith.constant 1.000000e-07 : f32
    %cst_8 = arith.constant 1.000000e+00 : f32
    %17 = vector.broadcast %cst_7 : f32 to vector<8x128xf32>
    %18 = arith.maximumf %17, %16 : vector<8x128xf32>
    %19 = vector.broadcast %cst_8 : f32 to vector<8x128xf32>
    %20 = arith.minimumf %19, %18 : vector<8x128xf32>
    %21 = math.log %20 : vector<8x128xf32>
    %cst_9 = arith.constant 0.699999988 : f32
    %22 = vector.broadcast %cst_9 : f32 to vector<8x128xf32>
    %23 = arith.mulf %22, %21 : vector<8x128xf32>
    %24 = math.exp %23 : vector<8x128xf32>
    %cst_10 = arith.constant 1.000000e+00 : f32
    %25 = vector.broadcast %cst_10 : f32 to vector<8x128xf32>
    %26 = arith.subf %25, %24 : vector<8x128xf32>
    %cst_11 = arith.constant 1.42857146 : f32
    %27 = vector.broadcast %cst_11 : f32 to vector<8x128xf32>
    %28 = arith.mulf %26, %27 : vector<8x128xf32>
    %29 = tpu.iota {dimensions = array<i32: 0>} : vector<8x128xi32>
    %30 = tpu.iota {dimensions = array<i32: 1>} : vector<8x128xi32>
    %c8_i32 = arith.constant 8 : i32
    %31 = arith.muli %arg0, %c8_i32 : i32
    %32 = vector.broadcast %31 : i32 to vector<8x128xi32>
    %33 = arith.addi %32, %29 : vector<8x128xi32>
    %c128_i32 = arith.constant 128 : i32
    %34 = vector.broadcast %c128_i32 : i32 to vector<8x128xi32>
    %35 = arith.muli %33, %34 : vector<8x128xi32>
    %36 = arith.addi %35, %30 : vector<8x128xi32>
    %c512_i32 = arith.constant 512 : i32
    %37 = vector.broadcast %c512_i32 : i32 to vector<8x128xi32>
    %38 = arith.cmpi slt, %36, %37 : vector<8x128xi32>
    %cst_12 = arith.constant 0.000000e+00 : f32
    %39 = vector.broadcast %cst_12 : f32 to vector<8x128xf32>
    %40 = arith.select %38, %28, %39 : vector<8x128xi1>, vector<8x128xf32>
    %c0_13 = arith.constant 0 : index
    %c0_14 = arith.constant 0 : index
    %41 = vector.load %arg4[%c0_13, %c0_14] : memref<1x128xf32, #tpu.memory_space<vmem>>, vector<1x128xf32>
    %cst_15 = arith.constant dense<0.000000e+00> : vector<128xf32>
    %42 = vector.multi_reduction <add>, %40, %cst_15 [0] : vector<8x128xf32> to vector<128xf32>
    %43 = vector.shape_cast %42 : vector<128xf32> to vector<1x128xf32>
    %44 = arith.addf %41, %43 : vector<1x128xf32>
    %c0_16 = arith.constant 0 : index
    %c0_17 = arith.constant 0 : index
    %45 = vector.load %arg4[%c0_16, %c0_17] : memref<1x128xf32, #tpu.memory_space<vmem>>, vector<1x128xf32>
    tpu.vector_store %arg4[%c0_16, %c0_17], %44 {strides = array<i32>} : memref<1x128xf32, #tpu.memory_space<vmem>>, vector<1x128xf32>,
    %c0_i32_18 = arith.constant 0 : i32
    %46 = arith.cmpi eq, %arg0, %c0_i32_18 : i32
    %47 = arith.extui %46 : i1 to i32
    %c0_i32_19 = arith.constant 0 : i32
    %48 = arith.cmpi ne, %47, %c0_i32_19 : i32
    scf.if %48 {
      %c0_20 = arith.constant 0 : index
      %c0_21 = arith.constant 0 : index
      %49 = vector.load %arg4[%c0_20, %c0_21] : memref<1x128xf32, #tpu.memory_space<vmem>>, vector<1x128xf32>
      %cst_22 = arith.constant dense<0.000000e+00> : vector<1xf32>
      %50 = vector.multi_reduction <add>, %49, %cst_22 [1] : vector<1x128xf32> to vector<1xf32>
      %51 = vector.shape_cast %50 : vector<1xf32> to vector<1x1xf32>
      %cst_23 = arith.constant 0.001953125 : f32
      %52 = vector.broadcast %cst_23 : f32 to vector<1x1xf32>
      %53 = arith.mulf %51, %52 : vector<1x1xf32>
      %c0_24 = arith.constant 0 : index
      %c0_25 = arith.constant 0 : index
      %54 = vector.load %arg3[%c0_24, %c0_25] : memref<1x1xf32, #tpu.memory_space<vmem>>, vector<1x1xf32>
      tpu.vector_store %arg3[%c0_24, %c0_25], %53 {strides = array<i32>} : memref<1x1xf32, #tpu.memory_space<vmem>>, vector<1x1xf32>,
    } else {
    }
    return
  }
  func.func @transform_0(%arg0: i32) -> (i32, i32) {
    %c0_i32 = arith.constant 0 : i32
    %c0_i32_0 = arith.constant 0 : i32
    return %arg0, %c0_i32 : i32, i32
  }
  func.func @transform_1(%arg0: i32) -> (i32, i32) {
    %c0_i32 = arith.constant 0 : i32
    %c0_i32_0 = arith.constant 0 : i32
    return %arg0, %c0_i32 : i32, i32
  }
  func.func @transform_2(%arg0: i32) -> (i32, i32) {
    %c0_i32 = arith.constant 0 : i32
    %c0_i32_0 = arith.constant 0 : i32
    %c0_i32_1 = arith.constant 0 : i32
    return %c0_i32, %c0_i32_0 : i32, i32
  }
}

</mosaic_0001>

<bundles_post_ra>
// kernel: tpu_custom_call.1
= control target key start
LH: loop header
LB: loop body
LE: loop exit
PB: predicated region body
PF: predicated region fallthrough
CT: control target
= control target key end

     0   :  { %7 = vsyncpa [#allocation4], 0  ;;  %s245_s0 = inlined_call_operand.hbm [shape: f32[8,128], index: 0, kind: input, shape index: {}]   ;;  %s246_s1 = inlined_call_operand.hbm [shape: s32[8,128], index: 1, kind: input, shape index: {}]   ;;  %s247_s2 = inlined_call_operand.hbm [shape: f32[1,1], index: 2, kind: output, shape index: {}]  }
   0x1   :  { %8 = vsyncpa [#allocation7], 0 }
   0x2   :  { %9 = vsyncpa [#allocation5], 0  ;;  %s15_s11 = sshll.u32 %s245_s0, 4  ;;  %s217_s12 = smov [#allocation3]   ;;  %s16_s11 = int_to_ptr.hbm [resolvable:$true] %s15_s11 }
   0x3   :  { %s17_s13 = sshll.u32 %s217_s12, 4  ;;  %s26_s16 = sshll.u32 %s246_s1, 4  ;;  %s18_s13 = int_to_ptr.vmem [resolvable:$true] %s17_s13  ;;  %s27_s16 = int_to_ptr.hbm [resolvable:$true] %s26_s16 }
   0x4   :  { %20 = dma.hbm_to_vmem [thread:$0]  %s16_s11, 128, %s18_s13, [#allocation4]  }
   0x5   :  { %s218_s17 = smov [#allocation6]  }
   0x6   :  { %s28_s18 = sshll.u32 %s218_s17, 4  ;;  %s29_s18 = int_to_ptr.vmem [resolvable:$true] %s28_s18 }
   0x7   :  { %31 = dma.hbm_to_vmem [thread:$0]  %s27_s16, 128, %s29_s18, [#allocation7]  }
   0x8   :  { %211 = dma.done.wait [#allocation4], 128  }
   0x9   :  { %212 = vsyncadd [#allocation4], 4294967168 }
   0xa   :  { %213 = dma.done.wait [#allocation7], 128  }
   0xb   :  { %214 = vsyncadd [#allocation7], 4294967168  ;;  %v219_v0 = vmov 0.0   ;;  %v45_v1 = vld [vmem:[#allocation3] sm:$0xff]  ;;  %v46_v13 = vld [vmem:[#allocation6] sm:$0xff]  ;;  %v78_v21 = vlaneseq  ;;  %vm102_vm6 = vcmask 1040384  }
   0xc   :  { %44 = vst [vmem:[#allocation2] sm:$0x1] %v219_v0  ;;  %v47_v2 = vsub.f32 0.0, %v45_v1  ;;  %vm66_vm4 = vcmp.eq.s32.totalorder %v46_v13, 1  ;;  %s220_s0 = smov [#allocation8]   ;;  %s116_s21 = sshll.u32 %s247_s2, 4  ;;  %s117_s21 = int_to_ptr.hbm [resolvable:$true] %s116_s21 }
   0xd   :  { %v79_v25 = vshrl.u32 %v78_v21, 7  ;;  %v81_v27 = vand.u32 127, %v78_v21  ;;  %s114_s1 = sshll.u32 %s220_s0, 4  ;;  %vm107_vm7 = vcmask 0   ;;  %s115_s1 = int_to_ptr.vmem [resolvable:$true] %s114_s1 }
   0xe   :  { %v48_v3 = vmul.f32 1.442695, %v47_v2 }
   0xf   :  { %v85_v28 = vmul.u32 128, %v79_v25 }
  0x10   :  { %131 = vpow2.f32 %v48_v3 }
  0x11   :  { %v86_v29 = vadd.s32 %v85_v28, %v81_v27 }
  0x13   :  { %vm87_vm5 = vcmp.lt.s32.totalorder %v86_v29, 512  ;;  %v89_v39 = vld [vmem:[#allocation2] sm:$0x1] }
  0x16   :  { %v132_v4 = vpop.eup %131 }
  0x17   :  { %v50_v5 = vadd.f32 1.0, %v132_v4 }
  0x19   :  { %133 = vrcp.f32 %v50_v5  ;;  %v62_v8 = vand.u32 2147483648, %v50_v5  ;;  %vm56_vm0 = vweird.f32 %v50_v5  ;;  %v60_v10 = vand.u32 2147483647, %v50_v5 }
  0x1b   :  { %v63_v12 = vor.u32 1.1754944e-38, %v62_v8  ;;  %vm61_vm3 = vcmp.eq.f32.partialorder %v60_v10, 8.507059e+37 }
  0x1f   :  { %v134_v6 = vpop.eup %133 }
  0x20   :  { %v52_v7 = vmul.f32 %v134_v6, %v50_v5  ;;  %vm57_vm1 = vweird.f32 %v134_v6 }
  0x21   :  { %vm58_vm2 = vmor %vm56_vm0, %vm57_vm1 }
  0x22   :  { %v53_v9 = vsub.f32 1.0, %v52_v7 }
  0x24   :  { %v54_v11 = vmul.f32 %v134_v6, %v53_v9 }
  0x26   :  { %v55_v14 = vadd.f32 %v134_v6, %v54_v11 }
  0x28   :  { %v59_v15 = vsel %vm58_vm2, %v134_v6, %v55_v14 }
  0x29   :  { %v64_v16 = vsel %vm61_vm3, %v63_v12, %v59_v15 }
  0x2a   :  { %v67_v17 = vsub.f32 1.0, %v64_v16 }
  0x2c   :  { %v68_v18 = vsel %vm66_vm4, %v64_v16, %v67_v17 }
  0x2d   :  { %v69_v19 = vmax.f32 %v68_v18, 1e-07 }
  0x2f   :  { %v70_v20 = vmin.f32 %v69_v19, 1.0 }
  0x31   :  { %135 = vlog2.f32 %v70_v20 }
  0x37   :  { %v136_v22 = vpop.eup %135 }
  0x38   :  { %v72_v23 = vmul.f32 0.6931472, %v136_v22 }
  0x3a   :  { %v73_v24 = vmul.f32 0.7, %v72_v23 }
  0x3c   :  { %v74_v26 = vmul.f32 1.442695, %v73_v24 }
  0x3e   :  { %137 = vpow2.f32 %v74_v26 }
  0x44   :  { %v138_v30 = vpop.eup %137 }
  0x45   :  { %v76_v31 = vsub.f32 1.0, %v138_v30 }
  0x47   :  { %v77_v32 = vmul.f32 1.4285715, %v76_v31 }
  0x49   :  { %v88_v33 = vsel %vm87_vm5, %v77_v32, 0.0 }
  0x4a   :  { %v90_v34 = vrot.slane %v88_v33, 4 }
  0x4c   :  { %v91_v35 = vadd.f32 %v90_v34, %v88_v33 }
  0x4e   :  { %v92_v36 = vrot.slane %v91_v35, 2 }
  0x50   :  { %v93_v37 = vadd.f32 %v92_v36, %v91_v35 }
  0x52   :  { %v94_v38 = vrot.slane %v93_v37, 1 }
  0x54   :  { %v95_v40 = vadd.f32 %v94_v38, %v93_v37 }
  0x56   :  { %v96_v41 = vadd.f32 %v95_v40, %v89_v39 }
  0x58   :  { %97 = vst [vmem:[#allocation2] sm:$0x1] %v96_v41 }
  0x5f   :  { %v101_v42 = vld [vmem:[#allocation2] sm:$0x1] }
  0x60   :  { %v103_v43 = vsel %vm102_vm6, %v101_v42, 0.0 }
  0x61   :  { %104 = vadd.xlane.f32.xlu0 %v103_v43 }
  0xd4   :  { %v105_v44 = vpop.xlane.xlu0 %104 }
  0xd5   :  { %v106_v45 = vmul.f32 0.001953125, %v105_v44 }
  0xd7   :  { %108 = vst.msk [vmem:[#allocation8] sm:$0x1] %vm107_vm7, %v106_v45 }
  0xd8   :  { %119 = dma.vmem_to_hbm [thread:$0]  %s115_s1, 16, %s117_s21, [#allocation5]  }
  0xd9   :  { %215 = dma.done.wait [#allocation5], 16  }
  0xda   :  { %216 = vsyncadd [#allocation5], 4294967280 }
  0xdb   :  { %124 = vsyncpa [#allocation4], 1 }
  0xdc   :  { %125 = vsyncpa [#allocation7], 1 }
  0xdd   :  { %126 = vsyncpa [#allocation5], 1 }

</bundles_post_ra>
